<compile_context>
chip_gen: v7x
topology: tpu7x:2x2x1
jax: 0.10.0
libtpu: 0.0.40
codegen_flags: <defaults>
</compile_context>

<pallas_src>
import functools
import math

import jax
import jax.numpy as jnp
from jax import lax
from jax.experimental import pallas as pl
from jax.experimental.pallas import tpu as pltpu


_TOKEN_TILE = 256   # rows per activation tile for the token-parallel kernels
_Q_TILE = 256       # query rows per attention grid step


def _vmem_limit_bytes():
    """Per-generation VMEM budget with headroom (fallback: v7x-safe 48 MiB)."""
    cap = None
    try:
        info = pltpu.get_tpu_info()
        cap = getattr(info, "vmem_capacity_bytes", None)
    except Exception:
        cap = None
    if not cap:
        cap = 64 * 1024 * 1024            # conservative (v7x per-TensorCore)
    budget = cap * 3 // 4                 # leave headroom for internal scratch
    return int(min(max(budget, 32 * 1024 * 1024), 100 * 1024 * 1024))


def _compiler_params(n_grid_dims):
    return pltpu.CompilerParams(
        dimension_semantics=("parallel",) * n_grid_dims,
        vmem_limit_bytes=_vmem_limit_bytes(),
    )


def _token_tiling(n):
    tile = n if n <= _TOKEN_TILE else _TOKEN_TILE
    return tile, (pl.cdiv(n, tile),)


def _matmul_t(a, w):
    """a: (m, k); w: (n, k) in PyTorch nn.Linear layout -> (m, n), f32 accum.

    Contracts the last dims of both operands, so the weight never needs a
    wrapper-side transpose; the MXU handles the transposed operand natively.
    """
    return lax.dot_general(a, w, (((1,), (1,)), ((), ())),
                           preferred_element_type=jnp.float32)


# --------------------------------------------------------------------------
# Kernels
# --------------------------------------------------------------------------
def _qkv_proj_kernel(x_ref, w_ref, b_ref, q_ref, k_ref, v_ref, *, q_scale):
    # x_ref: (tile_n, d_model) f32; w_ref: (3*d_model, d_model) bf16 (fused
    # Wq/Wk/Wv, resident); b_ref: (1, 3*d_model) f32.
    x = x_ref[...].astype(w_ref.dtype)                    # bf16 for the MXU
    qkv = _matmul_t(x, w_ref[...]) + b_ref[...]           # (tile_n, 3*dm) f32
    dm = q_ref.shape[-1]
    # 1/sqrt(d_k) folded into Q here (once, in f32) instead of scaling the
    # (tq, S) score matrices in the attention kernel.
    q_ref[...] = (qkv[:, :dm] * q_scale).astype(q_ref.dtype)
    k_ref[...] = qkv[:, dm:2 * dm].astype(k_ref.dtype)
    v_ref[...] = qkv[:, 2 * dm:].astype(v_ref.dtype)


def _mha_kernel(q_ref, k_ref, v_ref, bias_ref, o_ref, *, n_heads):
    # One (batch, q-tile) pair per grid step; all heads handled in-kernel via
    # static lane slices (no head transposes in HBM, no (S, S) full scores).
    # q_ref: (1, tq, d_model) bf16 (pre-scaled by 1/sqrt(d_k))
    # k_ref/v_ref: (1, S, d_model) bf16 (resident per batch)
    # bias_ref: (1, 1, S) f32 additive mask bias (0 keep / -1e9 mask)
    dm = q_ref.shape[-1]
    dk = dm // n_heads
    q = q_ref[0]                       # (tq, dm)
    k = k_ref[0]                       # (S,  dm)
    v = v_ref[0]                       # (S,  dm)
    bias = bias_ref[0]                 # (1,  S)
    for h in range(n_heads):           # static unroll over heads
        sl = slice(h * dk, (h + 1) * dk)
        scores = lax.dot_general(q[:, sl], k[:, sl], (((1,), (1,)), ((), ())),
                                 preferred_element_type=jnp.float32)  # (tq, S)
        scores = scores + bias
        scores = scores - jnp.max(scores, axis=-1, keepdims=True)
        p = jnp.exp(scores)                                   # unnormalized
        denom = jnp.sum(p, axis=-1, keepdims=True)            # (tq, 1)
        # dropout on attention weights == identity (eval mode)
        ctx_h = jnp.dot(p.astype(v.dtype), v[:, sl],
                        preferred_element_type=jnp.float32)   # (tq, dk)
        # normalize the small (tq, dk) context, not the (tq, S) probabilities
        ctx_h = ctx_h * pl.reciprocal(denom, approx=True)
        o_ref[0, :, sl] = ctx_h.astype(o_ref.dtype)


def _attn_out_ffn_kernel(x_ref, ctx_ref, wo_ref, bo_ref,
                         w1_ref, b1_ref, w2_ref, b2_ref, o_ref):
    # Fused: attention output projection + residual 1, then FFN + residual 2.
    x = x_ref[...].astype(jnp.float32)               # residual path stays f32
    ctx = ctx_ref[...]                               # bf16 attention context
    y = x + (_matmul_t(ctx, wo_ref[...]) + bo_ref[...])           # residual 1
    h = _matmul_t(y.astype(w1_ref.dtype), w1_ref[...]) + b1_ref[...]
    h = jnp.maximum(h, 0.0)                                       # ReLU (f32)
    ffn = _matmul_t(h.astype(w2_ref.dtype), w2_ref[...]) + b2_ref[...]
    o_ref[...] = (y + ffn).astype(o_ref.dtype)                    # residual 2


# --------------------------------------------------------------------------
# Wrappers
# --------------------------------------------------------------------------
def _qkv_projection(x2d, wqkv, bqkv, *, q_scale, compute_dtype):
    n, dm = x2d.shape
    tile_n, grid = _token_tiling(n)
    act = pl.BlockSpec((tile_n, dm), lambda i: (i, 0))
    out_sd = jax.ShapeDtypeStruct((n, dm), compute_dtype)
    return pl.pallas_call(
        functools.partial(_qkv_proj_kernel, q_scale=q_scale),
        grid=grid,
        in_specs=[act,
                  pl.BlockSpec((3 * dm, dm), lambda i: (0, 0)),   # resident
                  pl.BlockSpec((1, 3 * dm), lambda i: (0, 0))],   # resident
        out_specs=[act, act, act],
        out_shape=[out_sd, out_sd, out_sd],
        compiler_params=_compiler_params(1),
    )(x2d, wqkv, bqkv)


def _mha(q, k, v, bias, n_heads):
    # q/k/v: (B, S, d_model) bf16, token-major; bias: (B, 1, S) f32.
    b, s, dm = q.shape
    tq = s if s <= _Q_TILE else _Q_TILE
    grid = (b, pl.cdiv(s, tq))
    q_spec = pl.BlockSpec((1, tq, dm), lambda i, j: (i, j, 0))
    kv_spec = pl.BlockSpec((1, s, dm), lambda i, j: (i, 0, 0))    # resident per batch
    bias_spec = pl.BlockSpec((1, 1, s), lambda i, j: (i, 0, 0))
    return pl.pallas_call(
        functools.partial(_mha_kernel, n_heads=n_heads),
        grid=grid,
        in_specs=[q_spec, kv_spec, kv_spec, bias_spec],
        out_specs=q_spec,
        out_shape=jax.ShapeDtypeStruct((b, s, dm), q.dtype),
        compiler_params=_compiler_params(2),
    )(q, k, v, bias)


def _attn_out_and_ffn(x2d, ctx2d, wo, bo, w1, b1, w2, b2):
    n, dm = x2d.shape
    d_ff = w1.shape[0]
    tile_n, grid = _token_tiling(n)
    act = pl.BlockSpec((tile_n, dm), lambda i: (i, 0))
    return pl.pallas_call(
        _attn_out_ffn_kernel,
        grid=grid,
        in_specs=[
            act,                                                 # x (residual)
            pl.BlockSpec((tile_n, dm), lambda i: (i, 0)),        # attention ctx
            pl.BlockSpec((dm, dm), lambda i: (0, 0)),            # Wo (resident)
            pl.BlockSpec((1, dm), lambda i: (0, 0)),             # bo
            pl.BlockSpec((d_ff, dm), lambda i: (0, 0)),          # W1 (resident)
            pl.BlockSpec((1, d_ff), lambda i: (0, 0)),           # b1
            pl.BlockSpec((dm, d_ff), lambda i: (0, 0)),          # W2 (resident)
            pl.BlockSpec((1, dm), lambda i: (0, 0)),             # b2
        ],
        out_specs=act,
        out_shape=jax.ShapeDtypeStruct((n, dm), x2d.dtype),
        compiler_params=_compiler_params(1),
    )(x2d, ctx2d, wo, bo, w1, b1, w2, b2)


def prepare_params(params, compute_dtype=jnp.bfloat16):
    """One-time weight prep (parameter-load time, OUTSIDE the jitted forward):
    cast weights to the MXU compute dtype, fuse Wq/Wk/Wv, reshape biases."""
    w = lambda name: params[name].astype(compute_dtype)
    bvec = lambda name: params[name].astype(jnp.float32).reshape(1, -1)
    return {
        "wqkv": jnp.concatenate([w("wq"), w("wk"), w("wv")], axis=0),
        "bqkv": jnp.concatenate([bvec("bq"), bvec("bk"), bvec("bv")], axis=1),
        "wo": w("wo"), "bo": bvec("bo"),
        "w1": w("w1"), "b1": bvec("b1"),
        "w2": w("w2"), "b2": bvec("b2"),
    }


def encoder_layer(x, mask, prepared, n_heads):
    """EncoderLayer forward (residual-only SublayerConnection).

    x: (batch, seq, d_model) f32; mask: (batch, 1, seq), 1 = attend / 0 = mask.
    prepared: output of prepare_params() (bf16 fused weights, f32 biases).
    """
    b, s, dm = x.shape
    dk = dm // n_heads
    n = b * s
    compute_dtype = prepared["wqkv"].dtype

    x2d = x.reshape(n, dm)
    q2d, k2d, v2d = _qkv_projection(
        x2d, prepared["wqkv"], prepared["bqkv"],
        q_scale=1.0 / math.sqrt(dk), compute_dtype=compute_dtype)

    # Free reshapes only (token-major layout preserved) -- no head transposes.
    q = q2d.reshape(b, s, dm)
    k = k2d.reshape(b, s, dm)
    v = v2d.reshape(b, s, dm)

    # Additive mask bias: 0 where attended, -1e9 where masked.
    bias = (mask.astype(jnp.float32) - 1.0) * 1e9

    ctx = _mha(q, k, v, bias, n_heads)                  # (B, S, d_model) bf16

    out2d = _attn_out_and_ffn(x2d, ctx.reshape(n, dm),
                              prepared["wo"], prepared["bo"],
                              prepared["w1"], prepared["b1"],
                              prepared["w2"], prepared["b2"])
    return out2d.reshape(b, s, dm)


# --------------------------------------------------------------------------
# Pure-JAX f32 reference (mirrors the PyTorch forward semantics)
# --------------------------------------------------------------------------
def reference_encoder_layer(x, mask, params, n_heads):
    b, s, d = x.shape
    d_k = d // n_heads
    lin = lambda t, w, bb: jnp.einsum("bsd,od->bso", t, params[w]) + params[bb]

    def heads(t):
        return t.reshape(b, s, n_heads, d_k).transpose(0, 2, 1, 3)

    q = heads(lin(x, "wq", "bq"))
    k = heads(lin(x, "wk", "bk"))
    v = heads(lin(x, "wv", "bv"))
    scores = jnp.einsum("bhqd,bhkd->bhqk", q, k) / math.sqrt(d_k)
    scores = jnp.where(mask[:, None, :, :] == 0, -1e9, scores)
    p = jax.nn.softmax(scores, axis=-1)
    ctx = jnp.einsum("bhqk,bhkd->bhqd", p, v).transpose(0, 2, 1, 3).reshape(b, s, d)
    y = x + lin(ctx, "wo", "bo")
    h = jax.nn.relu(lin(y, "w1", "b1"))
    return y + lin(h, "w2", "b2")


if __name__ == "__main__":
    batch, seq, d_model, n_heads, d_ff = 2, 8, 32, 4, 64

    key = jax.random.PRNGKey(0)
    ks = jax.random.split(key, 14)

    def init_linear(kw, kb, d_out, d_in):
        w = jax.random.normal(kw, (d_out, d_in), jnp.float32) / math.sqrt(d_in)
        bb = jax.random.normal(kb, (d_out,), jnp.float32) * 0.1
        return w, bb

    params = {}
    params["wq"], params["bq"] = init_linear(ks[0], ks[1], d_model, d_model)
    params["wk"], params["bk"] = init_linear(ks[2], ks[3], d_model, d_model)
    params["wv"], params["bv"] = init_linear(ks[4], ks[5], d_model, d_model)
    params["wo"], params["bo"] = init_linear(ks[6], ks[7], d_model, d_model)
    params["w1"], params["b1"] = init_linear(ks[8], ks[9], d_ff, d_model)
    params["w2"], params["b2"] = init_linear(ks[10], ks[11], d_model, d_ff)

    x = jax.random.normal(ks[12], (batch, seq, d_model), dtype=jnp.float32)
    mask = jnp.ones((batch, 1, seq), dtype=jnp.float32)
    mask = mask.at[1, 0, seq - 2:].set(0.0)   # pad-mask last two keys of batch 1

    prepared = jax.block_until_ready(prepare_params(params))   # one-time prep

    fwd = jax.jit(functools.partial(encoder_layer, n_heads=n_heads))
    out = jax.block_until_ready(fwd(x, mask, prepared))

    ref = reference_encoder_layer(x, mask, params, n_heads)
    assert out.shape == (batch, seq, d_model)
    # bf16 matmuls with f32 accumulation (input + weight quantization to bf16
    # is intentional) -> loosened tolerance vs the f32 reference.
    assert jnp.allclose(out, ref, atol=5e-2, rtol=5e-2), (
        f"max abs diff {jnp.max(jnp.abs(out - ref))}")

    print("KERNEL_OK")
</pallas_src>

<mosaic_0001>
module attributes {stable_mosaic.version = 11 : i64} {
  func.func @_qkv_proj_kernel(%arg0: i32, %arg1: memref<16x32xf32, #tpu.memory_space<vmem>>, %arg2: memref<96x32xbf16, #tpu.memory_space<vmem>>, %arg3: memref<1x96xf32, #tpu.memory_space<vmem>>, %arg4: memref<16x32xbf16, #tpu.memory_space<vmem>>, %arg5: memref<16x32xbf16, #tpu.memory_space<vmem>>, %arg6: memref<16x32xbf16, #tpu.memory_space<vmem>>) attributes {dimension_semantics = [#tpu.dimension_semantics<parallel>], iteration_bounds = array<i64: 1>, scalar_prefetch = 0 : i64, scratch_operands = 0 : i64, tpu.core_type = #tpu.core_type<tc>, window_params = [{transform_indices = @transform_0, window_bounds = array<i64: 16, 32>}, {pipeline_mode = #tpu.pipeline_mode<synchronous>, transform_indices = @transform_1, window_bounds = array<i64: 96, 32>}, {pipeline_mode = #tpu.pipeline_mode<synchronous>, transform_indices = @transform_2, window_bounds = array<i64: 1, 96>}, {transform_indices = @transform_3, window_bounds = array<i64: 16, 32>}, {transform_indices = @transform_4, window_bounds = array<i64: 16, 32>}, {transform_indices = @transform_5, window_bounds = array<i64: 16, 32>}]} {
    %c0 = arith.constant 0 : index
    %c0_0 = arith.constant 0 : index
    %0 = vector.load %arg1[%c0, %c0_0] : memref<16x32xf32, #tpu.memory_space<vmem>>, vector<16x32xf32>
    %1 = arith.truncf %0 : vector<16x32xf32> to vector<16x32xbf16>
    %c0_1 = arith.constant 0 : index
    %c0_2 = arith.constant 0 : index
    %2 = vector.load %arg2[%c0_1, %c0_2] : memref<96x32xbf16, #tpu.memory_space<vmem>>, vector<96x32xbf16>
    %cst = arith.constant dense<0.000000e+00> : vector<16x96xf32>
    %3 = tpu.matmul %1, %2, %cst {dimension_numbers = #tpu.dot_dimension_numbers<[1], [1], [0], [0], [0, 0, 1, 0], [], []>} : vector<16x32xbf16>, vector<96x32xbf16>, vector<16x96xf32> -> vector<16x96xf32>
    %c0_3 = arith.constant 0 : index
    %c0_4 = arith.constant 0 : index
    %4 = vector.load %arg3[%c0_3, %c0_4] : memref<1x96xf32, #tpu.memory_space<vmem>>, vector<1x96xf32>
    %5 = vector.broadcast %4 : vector<1x96xf32> to vector<16x96xf32>
    %6 = arith.addf %3, %5 : vector<16x96xf32>
    %7 = vector.extract_strided_slice %6 {offsets = [0, 0], sizes = [16, 32], strides = [1, 1]} : vector<16x96xf32> to vector<16x32xf32>
    %cst_5 = arith.constant 0.353553385 : f32
    %8 = vector.broadcast %cst_5 : f32 to vector<16x32xf32>
    %9 = arith.mulf %7, %8 : vector<16x32xf32>
    %10 = arith.truncf %9 : vector<16x32xf32> to vector<16x32xbf16>
    %c0_6 = arith.constant 0 : index
    %c0_7 = arith.constant 0 : index
    %11 = vector.load %arg4[%c0_6, %c0_7] : memref<16x32xbf16, #tpu.memory_space<vmem>>, vector<16x32xbf16>
    tpu.vector_store %arg4[%c0_6, %c0_7], %10 {strides = array<i32>} : memref<16x32xbf16, #tpu.memory_space<vmem>>, vector<16x32xbf16>,
    %12 = vector.extract_strided_slice %6 {offsets = [0, 32], sizes = [16, 32], strides = [1, 1]} : vector<16x96xf32> to vector<16x32xf32>
    %13 = arith.truncf %12 : vector<16x32xf32> to vector<16x32xbf16>
    %c0_8 = arith.constant 0 : index
    %c0_9 = arith.constant 0 : index
    %14 = vector.load %arg5[%c0_8, %c0_9] : memref<16x32xbf16, #tpu.memory_space<vmem>>, vector<16x32xbf16>
    tpu.vector_store %arg5[%c0_8, %c0_9], %13 {strides = array<i32>} : memref<16x32xbf16, #tpu.memory_space<vmem>>, vector<16x32xbf16>,
    %15 = vector.extract_strided_slice %6 {offsets = [0, 64], sizes = [16, 32], strides = [1, 1]} : vector<16x96xf32> to vector<16x32xf32>
    %16 = arith.truncf %15 : vector<16x32xf32> to vector<16x32xbf16>
    %c0_10 = arith.constant 0 : index
    %c0_11 = arith.constant 0 : index
    %17 = vector.load %arg6[%c0_10, %c0_11] : memref<16x32xbf16, #tpu.memory_space<vmem>>, vector<16x32xbf16>
    tpu.vector_store %arg6[%c0_10, %c0_11], %16 {strides = array<i32>} : memref<16x32xbf16, #tpu.memory_space<vmem>>, vector<16x32xbf16>,
    return
  }
  func.func @transform_0(%arg0: i32) -> (i32, i32) {
    %c0_i32 = arith.constant 0 : i32
    %c0_i32_0 = arith.constant 0 : i32
    return %arg0, %c0_i32 : i32, i32
  }
  func.func @transform_1(%arg0: i32) -> (i32, i32) {
    %c0_i32 = arith.constant 0 : i32
    %c0_i32_0 = arith.constant 0 : i32
    %c0_i32_1 = arith.constant 0 : i32
    return %c0_i32, %c0_i32_0 : i32, i32
  }
  func.func @transform_2(%arg0: i32) -> (i32, i32) {
    %c0_i32 = arith.constant 0 : i32
    %c0_i32_0 = arith.constant 0 : i32
    %c0_i32_1 = arith.constant 0 : i32
    return %c0_i32, %c0_i32_0 : i32, i32
  }
  func.func @transform_3(%arg0: i32) -> (i32, i32) {
    %c0_i32 = arith.constant 0 : i32
    %c0_i32_0 = arith.constant 0 : i32
    return %arg0, %c0_i32 : i32, i32
  }
  func.func @transform_4(%arg0: i32) -> (i32, i32) {
    %c0_i32 = arith.constant 0 : i32
    %c0_i32_0 = arith.constant 0 : i32
    return %arg0, %c0_i32 : i32, i32
  }
  func.func @transform_5(%arg0: i32) -> (i32, i32) {
    %c0_i32 = arith.constant 0 : i32
    %c0_i32_0 = arith.constant 0 : i32
    return %arg0, %c0_i32 : i32, i32
  }
}

module attributes {stable_mosaic.version = 11 : i64} {
  func.func @_mha_kernel(%arg0: i32, %arg1: i32, %arg2: memref<1x8x32xbf16, #tpu.memory_space<vmem>>, %arg3: memref<1x8x32xbf16, #tpu.memory_space<vmem>>, %arg4: memref<1x8x32xbf16, #tpu.memory_space<vmem>>, %arg5: memref<1x1x8xf32, #tpu.memory_space<vmem>>, %arg6: memref<1x8x32xbf16, #tpu.memory_space<vmem>>) attributes {dimension_semantics = [#tpu.dimension_semantics<parallel>, #tpu.dimension_semantics<parallel>], iteration_bounds = array<i64: 2, 1>, scalar_prefetch = 0 : i64, scratch_operands = 0 : i64, tpu.core_type = #tpu.core_type<tc>, window_params = [{transform_indices = @transform_0, window_bounds = array<i64: 1, 8, 32>}, {transform_indices = @transform_1, window_bounds = array<i64: 1, 8, 32>}, {transform_indices = @transform_2, window_bounds = array<i64: 1, 8, 32>}, {transform_indices = @transform_3, window_bounds = array<i64: 1, 1, 8>}, {transform_indices = @transform_4, window_bounds = array<i64: 1, 8, 32>}]} {
    %c0 = arith.constant 0 : index
    %c0_0 = arith.constant 0 : index
    %c0_1 = arith.constant 0 : index
    %0 = vector.load %arg2[%c0, %c0_0, %c0_1] : memref<1x8x32xbf16, #tpu.memory_space<vmem>>, vector<1x8x32xbf16>
    %1 = vector.shape_cast %0 : vector<1x8x32xbf16> to vector<8x32xbf16>
    %c0_2 = arith.constant 0 : index
    %c0_3 = arith.constant 0 : index
    %c0_4 = arith.constant 0 : index
    %2 = vector.load %arg3[%c0_2, %c0_3, %c0_4] : memref<1x8x32xbf16, #tpu.memory_space<vmem>>, vector<1x8x32xbf16>
    %3 = vector.shape_cast %2 : vector<1x8x32xbf16> to vector<8x32xbf16>
    %c0_5 = arith.constant 0 : index
    %c0_6 = arith.constant 0 : index
    %c0_7 = arith.constant 0 : index
    %4 = vector.load %arg4[%c0_5, %c0_6, %c0_7] : memref<1x8x32xbf16, #tpu.memory_space<vmem>>, vector<1x8x32xbf16>
    %5 = vector.shape_cast %4 : vector<1x8x32xbf16> to vector<8x32xbf16>
    %c0_8 = arith.constant 0 : index
    %c0_9 = arith.constant 0 : index
    %c0_10 = arith.constant 0 : index
    %6 = vector.load %arg5[%c0_8, %c0_9, %c0_10] : memref<1x1x8xf32, #tpu.memory_space<vmem>>, vector<1x1x8xf32>
    %7 = vector.shape_cast %6 : vector<1x1x8xf32> to vector<1x8xf32>
    %8 = vector.extract_strided_slice %1 {offsets = [0, 0], sizes = [8, 8], strides = [1, 1]} : vector<8x32xbf16> to vector<8x8xbf16>
    %9 = vector.extract_strided_slice %3 {offsets = [0, 0], sizes = [8, 8], strides = [1, 1]} : vector<8x32xbf16> to vector<8x8xbf16>
    %cst = arith.constant dense<0.000000e+00> : vector<8x8xf32>
    %10 = tpu.matmul %8, %9, %cst {dimension_numbers = #tpu.dot_dimension_numbers<[1], [1], [0], [0], [0, 0, 1, 0], [], []>} : vector<8x8xbf16>, vector<8x8xbf16>, vector<8x8xf32> -> vector<8x8xf32>
    %11 = vector.broadcast %7 : vector<1x8xf32> to vector<8x8xf32>
    %12 = arith.addf %10, %11 : vector<8x8xf32>
    %cst_11 = arith.constant dense<0xFF800000> : vector<8xf32>
    %13 = vector.multi_reduction <maximumf>, %12, %cst_11 [1] : vector<8x8xf32> to vector<8xf32>
    %14 = vector.shape_cast %13 : vector<8xf32> to vector<8x1xf32>
    %15 = vector.broadcast %14 : vector<8x1xf32> to vector<8x8xf32>
    %16 = arith.subf %12, %15 : vector<8x8xf32>
    %17 = math.exp %16 : vector<8x8xf32>
    %cst_12 = arith.constant dense<0.000000e+00> : vector<8xf32>
    %18 = vector.multi_reduction <add>, %17, %cst_12 [1] : vector<8x8xf32> to vector<8xf32>
    %19 = vector.shape_cast %18 : vector<8xf32> to vector<8x1xf32>
    %20 = arith.truncf %17 : vector<8x8xf32> to vector<8x8xbf16>
    %21 = vector.extract_strided_slice %5 {offsets = [0, 0], sizes = [8, 8], strides = [1, 1]} : vector<8x32xbf16> to vector<8x8xbf16>
    %cst_13 = arith.constant dense<0.000000e+00> : vector<8x8xf32>
    %22 = tpu.matmul %20, %21, %cst_13 {dimension_numbers = #tpu.dot_dimension_numbers<[1], [0], [0], [1], [0, 0, 1, 1], [], []>} : vector<8x8xbf16>, vector<8x8xbf16>, vector<8x8xf32> -> vector<8x8xf32>
    %23 = tpu.reciprocal %19 {approx = true} : vector<8x1xf32> -> vector<8x1xf32>
    %24 = vector.broadcast %23 : vector<8x1xf32> to vector<8x8xf32>
    %25 = arith.mulf %22, %24 : vector<8x8xf32>
    %26 = arith.truncf %25 : vector<8x8xf32> to vector<8x8xbf16>
    %c0_14 = arith.constant 0 : index
    %c0_15 = arith.constant 0 : index
    %c0_16 = arith.constant 0 : index
    %27 = vector.load %arg6[%c0_14, %c0_15, %c0_16] : memref<1x8x32xbf16, #tpu.memory_space<vmem>>, vector<1x8x8xbf16>
    %28 = vector.shape_cast %27 : vector<1x8x8xbf16> to vector<8x8xbf16>
    %29 = vector.shape_cast %26 : vector<8x8xbf16> to vector<1x8x8xbf16>
    tpu.vector_store %arg6[%c0_14, %c0_15, %c0_16], %29 {strides = array<i32>} : memref<1x8x32xbf16, #tpu.memory_space<vmem>>, vector<1x8x8xbf16>,
    %30 = vector.extract_strided_slice %1 {offsets = [0, 8], sizes = [8, 8], strides = [1, 1]} : vector<8x32xbf16> to vector<8x8xbf16>
    %31 = vector.extract_strided_slice %3 {offsets = [0, 8], sizes = [8, 8], strides = [1, 1]} : vector<8x32xbf16> to vector<8x8xbf16>
    %cst_17 = arith.constant dense<0.000000e+00> : vector<8x8xf32>
    %32 = tpu.matmul %30, %31, %cst_17 {dimension_numbers = #tpu.dot_dimension_numbers<[1], [1], [0], [0], [0, 0, 1, 0], [], []>} : vector<8x8xbf16>, vector<8x8xbf16>, vector<8x8xf32> -> vector<8x8xf32>
    %33 = vector.broadcast %7 : vector<1x8xf32> to vector<8x8xf32>
    %34 = arith.addf %32, %33 : vector<8x8xf32>
    %cst_18 = arith.constant dense<0xFF800000> : vector<8xf32>
    %35 = vector.multi_reduction <maximumf>, %34, %cst_18 [1] : vector<8x8xf32> to vector<8xf32>
    %36 = vector.shape_cast %35 : vector<8xf32> to vector<8x1xf32>
    %37 = vector.broadcast %36 : vector<8x1xf32> to vector<8x8xf32>
    %38 = arith.subf %34, %37 : vector<8x8xf32>
    %39 = math.exp %38 : vector<8x8xf32>
    %cst_19 = arith.constant dense<0.000000e+00> : vector<8xf32>
    %40 = vector.multi_reduction <add>, %39, %cst_19 [1] : vector<8x8xf32> to vector<8xf32>
    %41 = vector.shape_cast %40 : vector<8xf32> to vector<8x1xf32>
    %42 = arith.truncf %39 : vector<8x8xf32> to vector<8x8xbf16>
    %43 = vector.extract_strided_slice %5 {offsets = [0, 8], sizes = [8, 8], strides = [1, 1]} : vector<8x32xbf16> to vector<8x8xbf16>
    %cst_20 = arith.constant dense<0.000000e+00> : vector<8x8xf32>
    %44 = tpu.matmul %42, %43, %cst_20 {dimension_numbers = #tpu.dot_dimension_numbers<[1], [0], [0], [1], [0, 0, 1, 1], [], []>} : vector<8x8xbf16>, vector<8x8xbf16>, vector<8x8xf32> -> vector<8x8xf32>
    %45 = tpu.reciprocal %41 {approx = true} : vector<8x1xf32> -> vector<8x1xf32>
    %46 = vector.broadcast %45 : vector<8x1xf32> to vector<8x8xf32>
    %47 = arith.mulf %44, %46 : vector<8x8xf32>
    %48 = arith.truncf %47 : vector<8x8xf32> to vector<8x8xbf16>
    %c0_21 = arith.constant 0 : index
    %c0_22 = arith.constant 0 : index
    %c8 = arith.constant 8 : index
    %49 = vector.load %arg6[%c0_21, %c0_22, %c8] : memref<1x8x32xbf16, #tpu.memory_space<vmem>>, vector<1x8x8xbf16>
    %50 = vector.shape_cast %49 : vector<1x8x8xbf16> to vector<8x8xbf16>
    %51 = vector.shape_cast %48 : vector<8x8xbf16> to vector<1x8x8xbf16>
    tpu.vector_store %arg6[%c0_21, %c0_22, %c8], %51 {strides = array<i32>} : memref<1x8x32xbf16, #tpu.memory_space<vmem>>, vector<1x8x8xbf16>,
    %52 = vector.extract_strided_slice %1 {offsets = [0, 16], sizes = [8, 8], strides = [1, 1]} : vector<8x32xbf16> to vector<8x8xbf16>
    %53 = vector.extract_strided_slice %3 {offsets = [0, 16], sizes = [8, 8], strides = [1, 1]} : vector<8x32xbf16> to vector<8x8xbf16>
    %cst_23 = arith.constant dense<0.000000e+00> : vector<8x8xf32>
    %54 = tpu.matmul %52, %53, %cst_23 {dimension_numbers = #tpu.dot_dimension_numbers<[1], [1], [0], [0], [0, 0, 1, 0], [], []>} : vector<8x8xbf16>, vector<8x8xbf16>, vector<8x8xf32> -> vector<8x8xf32>
    %55 = vector.broadcast %7 : vector<1x8xf32> to vector<8x8xf32>
    %56 = arith.addf %54, %55 : vector<8x8xf32>
    %cst_24 = arith.constant dense<0xFF800000> : vector<8xf32>
    %57 = vector.multi_reduction <maximumf>, %56, %cst_24 [1] : vector<8x8xf32> to vector<8xf32>
    %58 = vector.shape_cast %57 : vector<8xf32> to vector<8x1xf32>
    %59 = vector.broadcast %58 : vector<8x1xf32> to vector<8x8xf32>
    %60 = arith.subf %56, %59 : vector<8x8xf32>
    %61 = math.exp %60 : vector<8x8xf32>
    %cst_25 = arith.constant dense<0.000000e+00> : vector<8xf32>
    %62 = vector.multi_reduction <add>, %61, %cst_25 [1] : vector<8x8xf32> to vector<8xf32>
    %63 = vector.shape_cast %62 : vector<8xf32> to vector<8x1xf32>
    %64 = arith.truncf %61 : vector<8x8xf32> to vector<8x8xbf16>
    %65 = vector.extract_strided_slice %5 {offsets = [0, 16], sizes = [8, 8], strides = [1, 1]} : vector<8x32xbf16> to vector<8x8xbf16>
    %cst_26 = arith.constant dense<0.000000e+00> : vector<8x8xf32>
    %66 = tpu.matmul %64, %65, %cst_26 {dimension_numbers = #tpu.dot_dimension_numbers<[1], [0], [0], [1], [0, 0, 1, 1], [], []>} : vector<8x8xbf16>, vector<8x8xbf16>, vector<8x8xf32> -> vector<8x8xf32>
    %67 = tpu.reciprocal %63 {approx = true} : vector<8x1xf32> -> vector<8x1xf32>
    %68 = vector.broadcast %67 : vector<8x1xf32> to vector<8x8xf32>
    %69 = arith.mulf %66, %68 : vector<8x8xf32>
    %70 = arith.truncf %69 : vector<8x8xf32> to vector<8x8xbf16>
    %c0_27 = arith.constant 0 : index
    %c0_28 = arith.constant 0 : index
    %c16 = arith.constant 16 : index
    %71 = vector.load %arg6[%c0_27, %c0_28, %c16] : memref<1x8x32xbf16, #tpu.memory_space<vmem>>, vector<1x8x8xbf16>
    %72 = vector.shape_cast %71 : vector<1x8x8xbf16> to vector<8x8xbf16>
    %73 = vector.shape_cast %70 : vector<8x8xbf16> to vector<1x8x8xbf16>
    tpu.vector_store %arg6[%c0_27, %c0_28, %c16], %73 {strides = array<i32>} : memref<1x8x32xbf16, #tpu.memory_space<vmem>>, vector<1x8x8xbf16>,
    %74 = vector.extract_strided_slice %1 {offsets = [0, 24], sizes = [8, 8], strides = [1, 1]} : vector<8x32xbf16> to vector<8x8xbf16>
    %75 = vector.extract_strided_slice %3 {offsets = [0, 24], sizes = [8, 8], strides = [1, 1]} : vector<8x32xbf16> to vector<8x8xbf16>
    %cst_29 = arith.constant dense<0.000000e+00> : vector<8x8xf32>
    %76 = tpu.matmul %74, %75, %cst_29 {dimension_numbers = #tpu.dot_dimension_numbers<[1], [1], [0], [0], [0, 0, 1, 0], [], []>} : vector<8x8xbf16>, vector<8x8xbf16>, vector<8x8xf32> -> vector<8x8xf32>
    %77 = vector.broadcast %7 : vector<1x8xf32> to vector<8x8xf32>
    %78 = arith.addf %76, %77 : vector<8x8xf32>
    %cst_30 = arith.constant dense<0xFF800000> : vector<8xf32>
    %79 = vector.multi_reduction <maximumf>, %78, %cst_30 [1] : vector<8x8xf32> to vector<8xf32>
    %80 = vector.shape_cast %79 : vector<8xf32> to vector<8x1xf32>
    %81 = vector.broadcast %80 : vector<8x1xf32> to vector<8x8xf32>
    %82 = arith.subf %78, %81 : vector<8x8xf32>
    %83 = math.exp %82 : vector<8x8xf32>
    %cst_31 = arith.constant dense<0.000000e+00> : vector<8xf32>
    %84 = vector.multi_reduction <add>, %83, %cst_31 [1] : vector<8x8xf32> to vector<8xf32>
    %85 = vector.shape_cast %84 : vector<8xf32> to vector<8x1xf32>
    %86 = arith.truncf %83 : vector<8x8xf32> to vector<8x8xbf16>
    %87 = vector.extract_strided_slice %5 {offsets = [0, 24], sizes = [8, 8], strides = [1, 1]} : vector<8x32xbf16> to vector<8x8xbf16>
    %cst_32 = arith.constant dense<0.000000e+00> : vector<8x8xf32>
    %88 = tpu.matmul %86, %87, %cst_32 {dimension_numbers = #tpu.dot_dimension_numbers<[1], [0], [0], [1], [0, 0, 1, 1], [], []>} : vector<8x8xbf16>, vector<8x8xbf16>, vector<8x8xf32> -> vector<8x8xf32>
    %89 = tpu.reciprocal %85 {approx = true} : vector<8x1xf32> -> vector<8x1xf32>
    %90 = vector.broadcast %89 : vector<8x1xf32> to vector<8x8xf32>
    %91 = arith.mulf %88, %90 : vector<8x8xf32>
    %92 = arith.truncf %91 : vector<8x8xf32> to vector<8x8xbf16>
    %c0_33 = arith.constant 0 : index
    %c0_34 = arith.constant 0 : index
    %c24 = arith.constant 24 : index
    %93 = vector.load %arg6[%c0_33, %c0_34, %c24] : memref<1x8x32xbf16, #tpu.memory_space<vmem>>, vector<1x8x8xbf16>
    %94 = vector.shape_cast %93 : vector<1x8x8xbf16> to vector<8x8xbf16>
    %95 = vector.shape_cast %92 : vector<8x8xbf16> to vector<1x8x8xbf16>
    tpu.vector_store %arg6[%c0_33, %c0_34, %c24], %95 {strides = array<i32>} : memref<1x8x32xbf16, #tpu.memory_space<vmem>>, vector<1x8x8xbf16>,
    return
  }
  func.func @transform_0(%arg0: i32, %arg1: i32) -> (i32, i32, i32) {
    %c0_i32 = arith.constant 0 : i32
    %c0_i32_0 = arith.constant 0 : i32
    return %arg0, %arg1, %c0_i32 : i32, i32, i32
  }
  func.func @transform_1(%arg0: i32, %arg1: i32) -> (i32, i32, i32) {
    %c0_i32 = arith.constant 0 : i32
    %c0_i32_0 = arith.constant 0 : i32
    %c0_i32_1 = arith.constant 0 : i32
    return %arg0, %c0_i32, %c0_i32_0 : i32, i32, i32
  }
  func.func @transform_2(%arg0: i32, %arg1: i32) -> (i32, i32, i32) {
    %c0_i32 = arith.constant 0 : i32
    %c0_i32_0 = arith.constant 0 : i32
    %c0_i32_1 = arith.constant 0 : i32
    return %arg0, %c0_i32, %c0_i32_0 : i32, i32, i32
  }
  func.func @transform_3(%arg0: i32, %arg1: i32) -> (i32, i32, i32) {
    %c0_i32 = arith.constant 0 : i32
    %c0_i32_0 = arith.constant 0 : i32
    %c0_i32_1 = arith.constant 0 : i32
    return %arg0, %c0_i32, %c0_i32_0 : i32, i32, i32
  }
  func.func @transform_4(%arg0: i32, %arg1: i32) -> (i32, i32, i32) {
    %c0_i32 = arith.constant 0 : i32
    %c0_i32_0 = arith.constant 0 : i32
    return %arg0, %arg1, %c0_i32 : i32, i32, i32
  }
}

module attributes {stable_mosaic.version = 11 : i64} {
  func.func @_attn_out_ffn_kernel(%arg0: i32, %arg1: memref<16x32xf32, #tpu.memory_space<vmem>>, %arg2: memref<16x32xbf16, #tpu.memory_space<vmem>>, %arg3: memref<32x32xbf16, #tpu.memory_space<vmem>>, %arg4: memref<1x32xf32, #tpu.memory_space<vmem>>, %arg5: memref<64x32xbf16, #tpu.memory_space<vmem>>, %arg6: memref<1x64xf32, #tpu.memory_space<vmem>>, %arg7: memref<32x64xbf16, #tpu.memory_space<vmem>>, %arg8: memref<1x32xf32, #tpu.memory_space<vmem>>, %arg9: memref<16x32xf32, #tpu.memory_space<vmem>>) attributes {dimension_semantics = [#tpu.dimension_semantics<parallel>], iteration_bounds = array<i64: 1>, scalar_prefetch = 0 : i64, scratch_operands = 0 : i64, tpu.core_type = #tpu.core_type<tc>, window_params = [{transform_indices = @transform_0, window_bounds = array<i64: 16, 32>}, {transform_indices = @transform_1, window_bounds = array<i64: 16, 32>}, {pipeline_mode = #tpu.pipeline_mode<synchronous>, transform_indices = @transform_2, window_bounds = array<i64: 32, 32>}, {pipeline_mode = #tpu.pipeline_mode<synchronous>, transform_indices = @transform_3, window_bounds = array<i64: 1, 32>}, {pipeline_mode = #tpu.pipeline_mode<synchronous>, transform_indices = @transform_4, window_bounds = array<i64: 64, 32>}, {pipeline_mode = #tpu.pipeline_mode<synchronous>, transform_indices = @transform_5, window_bounds = array<i64: 1, 64>}, {pipeline_mode = #tpu.pipeline_mode<synchronous>, transform_indices = @transform_6, window_bounds = array<i64: 32, 64>}, {pipeline_mode = #tpu.pipeline_mode<synchronous>, transform_indices = @transform_7, window_bounds = array<i64: 1, 32>}, {transform_indices = @transform_8, window_bounds = array<i64: 16, 32>}]} {
    %c0 = arith.constant 0 : index
    %c0_0 = arith.constant 0 : index
    %0 = vector.load %arg1[%c0, %c0_0] : memref<16x32xf32, #tpu.memory_space<vmem>>, vector<16x32xf32>
    %c0_1 = arith.constant 0 : index
    %c0_2 = arith.constant 0 : index
    %1 = vector.load %arg2[%c0_1, %c0_2] : memref<16x32xbf16, #tpu.memory_space<vmem>>, vector<16x32xbf16>
    %c0_3 = arith.constant 0 : index
    %c0_4 = arith.constant 0 : index
    %2 = vector.load %arg3[%c0_3, %c0_4] : memref<32x32xbf16, #tpu.memory_space<vmem>>, vector<32x32xbf16>
    %cst = arith.constant dense<0.000000e+00> : vector<16x32xf32>
    %3 = tpu.matmul %1, %2, %cst {dimension_numbers = #tpu.dot_dimension_numbers<[1], [1], [0], [0], [0, 0, 1, 0], [], []>} : vector<16x32xbf16>, vector<32x32xbf16>, vector<16x32xf32> -> vector<16x32xf32>
    %c0_5 = arith.constant 0 : index
    %c0_6 = arith.constant 0 : index
    %4 = vector.load %arg4[%c0_5, %c0_6] : memref<1x32xf32, #tpu.memory_space<vmem>>, vector<1x32xf32>
    %5 = vector.broadcast %4 : vector<1x32xf32> to vector<16x32xf32>
    %6 = arith.addf %3, %5 : vector<16x32xf32>
    %7 = arith.addf %0, %6 : vector<16x32xf32>
    %8 = arith.truncf %7 : vector<16x32xf32> to vector<16x32xbf16>
    %c0_7 = arith.constant 0 : index
    %c0_8 = arith.constant 0 : index
    %9 = vector.load %arg5[%c0_7, %c0_8] : memref<64x32xbf16, #tpu.memory_space<vmem>>, vector<64x32xbf16>
    %cst_9 = arith.constant dense<0.000000e+00> : vector<16x64xf32>
    %10 = tpu.matmul %8, %9, %cst_9 {dimension_numbers = #tpu.dot_dimension_numbers<[1], [1], [0], [0], [0, 0, 1, 0], [], []>} : vector<16x32xbf16>, vector<64x32xbf16>, vector<16x64xf32> -> vector<16x64xf32>
    %c0_10 = arith.constant 0 : index
    %c0_11 = arith.constant 0 : index
    %11 = vector.load %arg6[%c0_10, %c0_11] : memref<1x64xf32, #tpu.memory_space<vmem>>, vector<1x64xf32>
    %12 = vector.broadcast %11 : vector<1x64xf32> to vector<16x64xf32>
    %13 = arith.addf %10, %12 : vector<16x64xf32>
    %cst_12 = arith.constant 0.000000e+00 : f32
    %14 = vector.broadcast %cst_12 : f32 to vector<16x64xf32>
    %15 = arith.maximumf %13, %14 : vector<16x64xf32>
    %16 = arith.truncf %15 : vector<16x64xf32> to vector<16x64xbf16>
    %c0_13 = arith.constant 0 : index
    %c0_14 = arith.constant 0 : index
    %17 = vector.load %arg7[%c0_13, %c0_14] : memref<32x64xbf16, #tpu.memory_space<vmem>>, vector<32x64xbf16>
    %cst_15 = arith.constant dense<0.000000e+00> : vector<16x32xf32>
    %18 = tpu.matmul %16, %17, %cst_15 {dimension_numbers = #tpu.dot_dimension_numbers<[1], [1], [0], [0], [0, 0, 1, 0], [], []>} : vector<16x64xbf16>, vector<32x64xbf16>, vector<16x32xf32> -> vector<16x32xf32>
    %c0_16 = arith.constant 0 : index
    %c0_17 = arith.constant 0 : index
    %19 = vector.load %arg8[%c0_16, %c0_17] : memref<1x32xf32, #tpu.memory_space<vmem>>, vector<1x32xf32>
    %20 = vector.broadcast %19 : vector<1x32xf32> to vector<16x32xf32>
    %21 = arith.addf %18, %20 : vector<16x32xf32>
    %22 = arith.addf %7, %21 : vector<16x32xf32>
    %c0_18 = arith.constant 0 : index
    %c0_19 = arith.constant 0 : index
    %23 = vector.load %arg9[%c0_18, %c0_19] : memref<16x32xf32, #tpu.memory_space<vmem>>, vector<16x32xf32>
    tpu.vector_store %arg9[%c0_18, %c0_19], %22 {strides = array<i32>} : memref<16x32xf32, #tpu.memory_space<vmem>>, vector<16x32xf32>,
    return
  }
  func.func @transform_0(%arg0: i32) -> (i32, i32) {
    %c0_i32 = arith.constant 0 : i32
    %c0_i32_0 = arith.constant 0 : i32
    return %arg0, %c0_i32 : i32, i32
  }
  func.func @transform_1(%arg0: i32) -> (i32, i32) {
    %c0_i32 = arith.constant 0 : i32
    %c0_i32_0 = arith.constant 0 : i32
    return %arg0, %c0_i32 : i32, i32
  }
  func.func @transform_2(%arg0: i32) -> (i32, i32) {
    %c0_i32 = arith.constant 0 : i32
    %c0_i32_0 = arith.constant 0 : i32
    %c0_i32_1 = arith.constant 0 : i32
    return %c0_i32, %c0_i32_0 : i32, i32
  }
  func.func @transform_3(%arg0: i32) -> (i32, i32) {
    %c0_i32 = arith.constant 0 : i32
    %c0_i32_0 = arith.constant 0 : i32
    %c0_i32_1 = arith.constant 0 : i32
    return %c0_i32, %c0_i32_0 : i32, i32
  }
  func.func @transform_4(%arg0: i32) -> (i32, i32) {
    %c0_i32 = arith.constant 0 : i32
    %c0_i32_0 = arith.constant 0 : i32
    %c0_i32_1 = arith.constant 0 : i32
    return %c0_i32, %c0_i32_0 : i32, i32
  }
  func.func @transform_5(%arg0: i32) -> (i32, i32) {
    %c0_i32 = arith.constant 0 : i32
    %c0_i32_0 = arith.constant 0 : i32
    %c0_i32_1 = arith.constant 0 : i32
    return %c0_i32, %c0_i32_0 : i32, i32
  }
  func.func @transform_6(%arg0: i32) -> (i32, i32) {
    %c0_i32 = arith.constant 0 : i32
    %c0_i32_0 = arith.constant 0 : i32
    %c0_i32_1 = arith.constant 0 : i32
    return %c0_i32, %c0_i32_0 : i32, i32
  }
  func.func @transform_7(%arg0: i32) -> (i32, i32) {
    %c0_i32 = arith.constant 0 : i32
    %c0_i32_0 = arith.constant 0 : i32
    %c0_i32_1 = arith.constant 0 : i32
    return %c0_i32, %c0_i32_0 : i32, i32
  }
  func.func @transform_8(%arg0: i32) -> (i32, i32) {
    %c0_i32 = arith.constant 0 : i32
    %c0_i32_0 = arith.constant 0 : i32
    return %arg0, %c0_i32 : i32, i32
  }
}

</mosaic_0001>

<bundles_post_ra>
// kernel: encoder_layer.3
= control target key start
LH: loop header
LB: loop body
LE: loop exit
PB: predicated region body
PF: predicated region fallthrough
CT: control target
= control target key end

     0   :  { %vm70_vm0 = vcmask 261120   ;;  %v229_v0 = vmov 0.0   ;;  %vm230_vm1 = vmmov 0   ;;  %vm143_vm2 = vcmask 257024   ;;  %s321_s1 = inlined_call_operand.vmem [shape: bf16[96,32], index: 1, kind: input, shape index: {}]   ;;  %s322_s0 = inlined_call_operand.vmem [shape: f32[16,32], index: 0, kind: input, shape index: {}]   ;;  %s323_s2 = inlined_call_operand.vmem [shape: f32[1,96], index: 2, kind: input, shape index: {}]   ;;  %s324_s3 = inlined_call_operand.vmem [shape: bf16[16,32], index: 3, kind: output, shape index: {0}]   ;;  %s325_s5 = inlined_call_operand.vmem [shape: bf16[16,32], index: 5, kind: output, shape index: {2}]   ;;  %s326_s4 = inlined_call_operand.vmem [shape: bf16[16,32], index: 4, kind: output, shape index: {1}]  }
   0x1   :  { %203 = vmatprep.subr.bf16.mxu0 %v229_v0  ;;  %v223_v1 = vld [vmem:[%s321_s1] sm:$0xff]   ;;  %215 = vmatprep.mubr.msk.bf16.mxu0 %vm230_vm1, %v229_v0  ;;  %v224_v3 = vld [vmem:[%s321_s1 + $0x8] sm:$0xff]   ;;  %v225_v5 = vld [vmem:[%s321_s1 + $0x10] sm:$0xff]  }
   0x2   :  { %v75_v2 = vsel %vm70_vm0, %v223_v1, 0  ;;  %v78_v4 = vsel %vm70_vm0, %v224_v3, 0  ;;  %v81_v6 = vsel %vm70_vm0, %v225_v5, 0  ;;  %v226_v7 = vld [vmem:[%s321_s1 + $0x18] sm:$0xff]   ;;  %v227_v9 = vld [vmem:[%s321_s1 + $0x20] sm:$0xff]   ;;  %v228_v11 = vld [vmem:[%s321_s1 + $0x28] sm:$0xff]  }
   0x3   :  { %204 = vmatpush3.bf16.xpose.msra.mxu0 %v75_v2  ;;  %v84_v8 = vsel %vm70_vm0, %v226_v7, 0  ;;  %v87_v10 = vsel %vm70_vm0, %v227_v9, 0  ;;  %v90_v12 = vsel %vm70_vm0, %v228_v11, 0  ;;  %v18_v13 = vld [vmem:[%s322_s0] sm:$0xff]  ;;  %v19_v14 = vld [vmem:[%s322_s0 + $0x8] sm:$0xff]  ;;  %s231_s1 = smov 64  }
   0x4   :  { %205 = vmatprep.subr.bf16.mxu0 %v229_v0  ;;  %v20_v15 = vpack.c.bf16 %v19_v14, %v18_v13  ;;  %v180_v16 = vld [vmem:[%s323_s2] ss:$0 sm:$0xff]  ;;  %s232_s0 = smov 96  }
   0xb   :  { %206 = vmatpush3.bf16.xpose.msra.mxu0 %v78_v4 }
   0xc   :  { %207 = vmatprep.subr.bf16.mxu0 %v229_v0 }
  0x13   :  { %208 = vmatpush3.bf16.xpose.msra.mxu0 %v81_v6 }
  0x14   :  { %209 = vmatprep.subr.bf16.mxu0 %v229_v0 }
  0x1b   :  { %210 = vmatpush3.bf16.xpose.msra.mxu0 %v84_v8 }
  0x1c   :  { %211 = vmatprep.subr.bf16.mxu0 %v229_v0 }
  0x23   :  { %212 = vmatpush3.bf16.xpose.msra.mxu0 %v87_v10 }
  0x24   :  { %213 = vmatprep.subr.bf16.mxu0 %v229_v0 }
  0x2b   :  { %214 = vmatpush3.bf16.xpose.msra.mxu0 %v90_v12 }
  0x32   :  { %216 = vmatmul.mubr.msk.bf16.vlgmr.msra.gmra.mrb[0].mxu0 %vm70_vm0, %v20_v15 }
 0x105   :  { %v126_v17 = vpop.f32.mrb[0].mxu0 }
 0x106   :  { %v127_v18 = vadd.f32 %v180_v16, %v126_v17  ;;  %v217_v19 = vpop.f32.mrb[1].mxu0 }
 0x107   :  { %v129_v20 = vpop.f32.mrb[2].mxu0 }
 0x108   :  { %v133_v21 = vmul.f32 0.35355338, %v127_v18  ;;  %v130_v22 = vadd.f32 %v180_v16, %v129_v20  ;;  %v218_v23 = vpop.f32.mrb[3].mxu0  ;;  %v194_v24 = vpack.c.bf16 %v127_v18, %v127_v18 }
 0x10a   :  { %v192_v25 = vpack.c.bf16 %v133_v21, %v133_v21  ;;  %v134_v26 = vmul.f32 0.35355338, %v130_v22  ;;  %160 = vrot.lane.b32.xlu1 %v194_v24, %s231_s1  ;;  %152 = vrot.lane.b32.xlu0 %v194_v24, %s232_s0  ;;  %v195_v28 = vpack.c.bf16 %v130_v22, %v130_v22 }
 0x10c   :  { %144 = vst.msk [vmem:[%s324_s3] sm:$0xf] %vm143_vm2, %v192_v25  ;;  %v193_v27 = vpack.c.bf16 %v134_v26, %v134_v26 }
 0x10e   :  { %145 = vst.msk [vmem:[%s324_s3 + $0x4] sm:$0xf] %vm143_vm2, %v193_v27  ;;  %162 = vrot.lane.b32.xlu1 %v195_v28, %s231_s1  ;;  %154 = vrot.lane.b32.xlu0 %v195_v28, %s232_s0 }
 0x17c   :  { %v161_v29 = vpop.permute.xlu1 %160  ;;  %v153_v30 = vpop.permute.xlu0 %152 }
 0x17d   :  { %166 = vst.msk [vmem:[%s325_s5] sm:$0xf] %vm143_vm2, %v161_v29  ;;  %158 = vst.msk [vmem:[%s326_s4] sm:$0xf] %vm143_vm2, %v153_v30 }
 0x180   :  { %v163_v31 = vpop.permute.xlu1 %162  ;;  %v155_v32 = vpop.permute.xlu0 %154 }
 0x181   :  { %167 = vst.msk [vmem:[%s325_s5 + $0x4] sm:$0xf] %vm143_vm2, %v163_v31  ;;  %159 = vst.msk [vmem:[%s326_s4 + $0x4] sm:$0xf] %vm143_vm2, %v155_v32 }

// kernel: encoder_layer.5
= control target key start
LH: loop header
LB: loop body
LE: loop exit
PB: predicated region body
PF: predicated region fallthrough
CT: control target
= control target key end

     0   :  { %v393_v1 = vmov 0.0   ;;  %vm61_vm0 = vcmask 261120   ;;  %vm394_vm1 = vmmov 0   ;;  %s513_s0 = inlined_call_operand.vmem [shape: f32[16,32], index: 0, kind: input, shape index: {}]   ;;  %s514_s1 = inlined_call_operand.vmem [shape: bf16[16,32], index: 1, kind: input, shape index: {}]   ;;  %s515_s2 = inlined_call_operand.vmem [shape: bf16[32,32], index: 2, kind: input, shape index: {}]   ;;  %s516_s3 = inlined_call_operand.vmem [shape: f32[1,32], index: 3, kind: input, shape index: {}]   ;;  %s517_s4 = inlined_call_operand.vmem [shape: bf16[64,32], index: 4, kind: input, shape index: {}]   ;;  %s518_s5 = inlined_call_operand.vmem [shape: f32[1,64], index: 5, kind: input, shape index: {}]   ;;  %s519_s6 = inlined_call_operand.vmem [shape: bf16[32,64], index: 6, kind: input, shape index: {}]   ;;  %s520_s7 = inlined_call_operand.vmem [shape: f32[1,32], index: 7, kind: input, shape index: {}]   ;;  %s521_s8 = inlined_call_operand.hbm [shape: f32[16,32], index: 8, kind: output, shape index: {}]  }
   0x1   :  { %v360_v0 = vld [vmem:[%s515_s2] sm:$0xff]   ;;  %327 = vmatprep.subr.bf16.mxu0 %v393_v1  ;;  %335 = vmatprep.subr.bf16.mxu1 %v393_v1  ;;  %v361_v3 = vld [vmem:[%s515_s2 + $0x8] sm:$0xff]  }
   0x2   :  { %v66_v2 = vsel %vm61_vm0, %v360_v0, 0  ;;  %331 = vmatprep.mubr.msk.bf16.mxu0 %vm394_vm1, %v393_v1  ;;  %v363_v4 = vld [vmem:[%s517_s4] sm:$0xff]   ;;  %343 = vmatprep.mubr.msk.bf16.mxu1 %vm394_vm1, %v393_v1  ;;  %v69_v6 = vsel %vm61_vm0, %v361_v3, 0  ;;  %v364_v7 = vld [vmem:[%s517_s4 + $0x8] sm:$0xff]  }
   0x3   :  { %328 = vmatpush3.bf16.xpose.msra.mxu0 %v66_v2  ;;  %v154_v5 = vsel %vm61_vm0, %v363_v4, 0 }
   0x4   :  { %329 = vmatprep.subr.bf16.mxu0 %v393_v1  ;;  %336 = vmatpush3.bf16.xpose.msra.mxu1 %v154_v5 }
   0x5   :  { %337 = vmatprep.subr.bf16.mxu1 %v393_v1 }
   0x6   :  { %13 = vsyncpa [#allocation3], 0  ;;  %v157_v8 = vsel %vm61_vm0, %v364_v7, 0  ;;  %v362_v9 = vld [vmem:[%s514_s1] sm:$0xff]   ;;  %v365_v10 = vld [vmem:[%s517_s4 + $0x10] sm:$0xff]   ;;  %vm230_vm2 = vcmask 523264  }
   0x7   :  { %v160_v11 = vsel %vm61_vm0, %v365_v10, 0  ;;  %v366_v12 = vld [vmem:[%s517_s4 + $0x18] sm:$0xff]   ;;  %v367_v14 = vld [vmem:[%s519_s6] sm:$0xff]   ;;  %v32_v21 = vld [vmem:[%s513_s0 + $0x8] sm:$0xff]  ;;  %s395_s27 = smov [#allocation2]  }
   0x8   :  { %v163_v13 = vsel %vm61_vm0, %v366_v12, 0  ;;  %v235_v15 = vsel %vm230_vm2, %v367_v14, 0  ;;  %v301_v16 = vld [vmem:[%s516_s3] ss:$0 sm:$0xff]  ;;  %v368_v28 = vld [vmem:[%s519_s6 + $0x8] sm:$0xff]  }
   0x9   :  { %v31_v20 = vld [vmem:[%s513_s0] sm:$0xff]  ;;  %v238_v29 = vsel %vm230_vm2, %v368_v28, 0 }
   0xa   :  { %v306_v30 = vld [vmem:[%s518_s5] ss:$0 sm:$0xff]  ;;  %s290_s5 = sshll.u32 %s395_s27, 4  ;;  %s291_s5 = int_to_ptr.vmem [resolvable:$true] %s290_s5 }
   0xb   :  { %330 = vmatpush3.bf16.xpose.msra.mxu0 %v69_v6  ;;  %v312_v40 = vld [vmem:[%s520_s7] ss:$0 sm:$0xff]  ;;  %s369_s28 = scalar_lea.vmem %s291_s5, 256  ;;  %p374_p1 = scmp.lt.s32.totalorder %s291_s5, %s291_s5 }
   0xc   :  { %347 = vmatprep.subr.bf16.mxu0 %v393_v1  ;;  %338 = vmatpush3.bf16.xpose.msra.mxu1 %v157_v8  ;;  %p370_p0 = scmp.ne.s32.totalorder %s291_s5, %s369_s28  ;;  %p375_p2 = scmp.lt.s32.totalorder %s369_s28, %s369_s28 }
   0xd   :  { %339 = vmatprep.subr.bf16.mxu1 %v393_v1 }
   0xe   :  { %p376_p3 = por %p375_p2, %p374_p1 }
  0x10   :  { %p377_p4 = pnand %p376_p3, %p370_p0 }
  0x12   :  { %332 = vmatmul.mubr.msk.bf16.vlgmr.msra.gmra.mrb[0].mxu0 %vm61_vm0, %v362_v9 }
  0x13   :  { %351 = vmatprep.mubr.msk.bf16.mxu0 %vm394_vm1, %v393_v1  ;;  %348 = vmatpush3.bf16.xpose.msra.mxu0 %v235_v15 }
  0x14   :  { %340 = vmatpush3.bf16.xpose.msra.mxu1 %v160_v11  ;;  %349 = vmatprep.subr.bf16.mxu0 %v393_v1 }
  0x15   :  { %341 = vmatprep.subr.bf16.mxu1 %v393_v1 }
  0x1b   :  { %350 = vmatpush3.bf16.xpose.msra.mxu0 %v238_v29 }
  0x1c   :  { %342 = vmatpush3.bf16.xpose.msra.mxu1 %v163_v13 }
  0xe5   :  { %v105_v17 = vpop.f32.mrb[0].mxu0 }
  0xe6   :  { %v106_v18 = vadd.f32 %v301_v16, %v105_v17  ;;  %v333_v19 = vpop.f32.mrb[1].mxu0 }
  0xe7   :  { %v108_v22 = vpop.f32.mrb[2].mxu0 }
  0xe8   :  { %v109_v23 = vadd.f32 %v301_v16, %v108_v22  ;;  %v334_v24 = vpop.f32.mrb[3].mxu0  ;;  %v112_v25 = vadd.f32 %v106_v18, %v31_v20 }
  0xea   :  { %v113_v26 = vadd.f32 %v109_v23, %v32_v21 }
  0xec   :  { %v114_v27 = vpack.c.bf16 %v113_v26, %v112_v25 }
  0xee   :  { %344 = vmatmul.mubr.msk.bf16.vlgmr.msra.gmra.mrb[0].mxu1 %vm61_vm0, %v114_v27 }
 0x1c1   :  { %v199_v31 = vpop.f32.mrb[0].mxu1 }
 0x1c2   :  { %v200_v32 = vadd.f32 %v306_v30, %v199_v31  ;;  %v345_v33 = vpop.f32.mrb[1].mxu1 }
 0x1c3   :  { %v202_v34 = vpop.f32.mrb[2].mxu1 }
 0x1c4   :  { %v203_v35 = vadd.f32 %v306_v30, %v202_v34  ;;  %v346_v36 = vpop.f32.mrb[3].mxu1  ;;  %v206_v37 = vmax.f32 %v200_v32, 0.0 }
 0x1c6   :  { %v207_v38 = vmax.f32 %v203_v35, 0.0 }
 0x1c8   :  { %v208_v39 = vpack.c.bf16 %v207_v38, %v206_v37 }
 0x1ca   :  { %352 = vmatmul.mubr.msk.bf16.vlgmr.msra.gmra.mrb[4].mxu0 %vm230_vm2, %v208_v39 }
 0x29d   :  { %v274_v41 = vpop.f32.mrb[4].mxu0 }
 0x29e   :  { %v275_v42 = vadd.f32 %v312_v40, %v274_v41  ;;  %v353_v43 = vpop.f32.mrb[5].mxu0 }
 0x29f   :  { %v277_v44 = vpop.f32.mrb[6].mxu0 }
 0x2a0   :  { %v281_v45 = vadd.f32 %v275_v42, %v112_v25  ;;  %v278_v46 = vadd.f32 %v312_v40, %v277_v44  ;;  %v354_v47 = vpop.f32.mrb[7].mxu0 }
 0x2a2   :  { %283 = vst.msk [vmem:[#allocation2] sm:$0xff] %vm61_vm0, %v281_v45  ;;  %v282_v48 = vadd.f32 %v278_v46, %v113_v26 }
 0x2a4   :  { %284 = vst.msk [vmem:[#allocation2 + $0x8] sm:$0xff] %vm61_vm0, %v282_v48 }
 0x2a5   :  { %380 = shalt.err (!%p377_p4)
}
 0x2a6   :  { %s381_s30 = scalar_lea.hbm %s521_s8, 256 }
 0x2a7   :  { %p382_p5 = scmp.ne.s32.totalorder %s521_s8, %s381_s30  ;;  %p385_p6 = scmp.lt.u32.totalorder %s381_s30, %s521_s8 }
 0x2a9   :  { %p387_p7 = pnand %p385_p6, %p382_p5 }
 0x2ab   :  { %390 = shalt.err (!%p387_p7)
}
 0x2ac   :  { %s396_s2 = smov 128   ;;  %s397_s13 = smov 8  }
 0x2ad   :  { %296 = dma.vmem_to_hbm [thread:$0]  %s291_s5, 256, %s521_s8, [#allocation3], %s396_s2, %s396_s2, %s397_s13  }
 0x2ae   :  { %391 = dma.done.wait [#allocation3], 256  }
 0x2af   :  { %392 = vsyncadd [#allocation3], 4294967040 }
 0x2b0   :  { %300 = vsyncpa [#allocation3], 1 }

// kernel: encoder_layer.4
= control target key start
LH: loop header
LB: loop body
LE: loop exit
PB: predicated region body
PF: predicated region fallthrough
CT: control target
= control target key end

     0   :  { %s1066_s15 = smov 0   ;;  %s1068_s16 = smov 0   ;;  %s1191_s0 = inlined_call_operand.vmem [shape: bf16[2,8,32], index: 0, kind: input, shape index: {}]   ;;  %s1192_s1 = inlined_call_operand.vmem [shape: bf16[2,8,32], index: 1, kind: input, shape index: {}]   ;;  %s1193_s2 = inlined_call_operand.vmem [shape: bf16[2,8,32], index: 2, kind: input, shape index: {}]   ;;  %s1194_s3 = inlined_call_operand.vmem [shape: f32[2,1,8], index: 3, kind: input, shape index: {}]   ;;  %s1195_s4 = inlined_call_operand.vmem [shape: bf16[2,8,32], index: 4, kind: output, shape index: {}]  }
   0x1   :  { %s1070_s17 = smov 0  }
   0x2 LB: > { %s26_s18 = sadd.s32 1, %s1027_s16  ;;  %p869_p0 = scmp.ge.s32.totalorder %s1031_s17, 1  ;;  %s1031_s17 = sphi %s1070_s17, %s14_s17   ;;  %s1027_s16 = sphi %s1068_s16, %s1197_s16   ;;  %s1023_s15 = sphi %s1066_s15, %s1196_s15  }
   0x3   : > { %p28_p1 = scmp.ge.s32.totalorder %s26_s18, 2  ;;  %p206_p2 = scmp.lt.s32.totalorder %s1031_s17, 3 }
   0x5   : > { %s1199_s18 = smov (%p28_p1, %s26_s18), 0  ;;  %p207_p3 = pnand %p869_p0, %p206_p2 }
   0x6   : > { %p247_p4 = scmp.lt.s32.totalorder (!%p207_p3), %s1023_s15, 1  ;;  %v1033_v0 = vmov (!%p207_p3), 0.0   ;;  %vm1034_vm0 = vmmov (!%p207_p3), 0   ;;  %vm283_vm1 = vcmask (!%p207_p3), 64512   ;;  %s1035_s26 = smov (!%p207_p3), 120   ;;  %vm343_vm2 = vcmask (!%p207_p3), 1043456  }
   0x7   : > { %210 = sbr.rel (%p207_p3) target bundleno = 1167 (0x48f), region = 36  ;;  %910 = vmatprep.subr.bf16.mxu0 (!%p207_p3), %v1033_v0  ;;  %912 = vmatprep.mubr.msk.bf16.mxu0 (!%p207_p3), %vm1034_vm0, %v1033_v0  ;;  %s1036_s27 = smov (!%p207_p3), 112   ;;  %vm390_vm3 = vcmask (!%p207_p3), 60416   ;;  %vm518_vm4 = vcmask (!%p207_p3), 126016   ;;  %vm637_vm5 = vcmask (!%p207_p3), 191616   ;;  %vm756_vm6 = vcmask (!%p207_p3), 257216  }
   0x8   : > { %916 = vmatprep.subr.bf16.mxu1 (!%p207_p3), %v1033_v0  ;;  %918 = vmatprep.mubr.msk.bf16.mxu1 (!%p207_p3), %vm1034_vm0, %v1033_v0  ;;  %s1037_s28 = smov (!%p207_p3), 104   ;;  %s1038_s12 = smov (!%p207_p3), 8  }
   0x9   : > { %s1039_s13 = smov (!%p207_p3), 16   ;;  %s1040_s14 = smov (!%p207_p3), 24  }
   0xe   : > { %s1201_s15 = smov (!%p247_p4, %s1023_s15), 1 }
   0xf   : > { %s1090_s19 = sshll.u32 %s1201_s15, 2  ;;  %s264_s5 = scalar_lea.vmem %s1194_s3, %s1201_s15 }
  0x10   : > { %s257_s22 = scalar_lea.vmem %s1192_s1, %s1090_s19  ;;  %s253_s25 = scalar_lea.vmem %s1191_s0, %s1090_s19  ;;  %v1113_v6 = vld [vmem:[%s264_s5] ss:$0 sm:$0xff] }
  0x11   : > { %v274_v1 = vld [vmem:[%s257_s22] sm:$0xf]  ;;  %s261_s8 = scalar_lea.vmem %s1193_s2, %s1090_s19  ;;  %s1176_s11 = scalar_lea.vmem %s1195_s4, %s1090_s19 }
  0x12   : > { %v288_v2 = vsel %vm283_vm1, %v274_v1, 0  ;;  %v273_v3 = vld [vmem:[%s253_s25] sm:$0xf]  ;;  %v878_v5 = vcombine.low %v274_v1, %v274_v1 }
  0x13   : > { %911 = vmatpush3.bf16.xpose.msra.mxu0 %v288_v2  ;;  %v877_v4 = vcombine.low %v273_v3, %v273_v3  ;;  %v275_v13 = vld [vmem:[%s261_s8] sm:$0xf] }
  0x14   : > { %928 = vmatprep.subr.bf16.mxu0 %v1033_v0  ;;  %v345_v14 = vsel %vm343_vm2, %v275_v13, 0  ;;  %v880_v46 = vcombine.low %v275_v13, %v275_v13 }
  0x15   : > { %395 = vrot.lane.b32.xlu1 %v877_v4, %s1035_s26  ;;  %917 = vmatpush3.bf16.msra.mxu1 %v345_v14 }
  0x16   : > { %922 = vmatprep.subr.bf16.mxu1 %v1033_v0 }
  0x19   : > { %522 = vrot.lane.b32.xlu1 %v878_v5, %s1036_s27 }
  0x1a   : > { %913 = vmatmul.mubr.msk.bf16.vlgmr.msra.gmra.mrb[0].mxu0 %vm283_vm1, %v273_v3 }
  0x1b   : > { %930 = vmatprep.mubr.msk.bf16.mxu0 %vm1034_vm0, %v1033_v0 }
  0x1d   : > { %520 = vrot.lane.b32.xlu1 %v877_v4, %s1036_s27 }
  0x21   : > { %641 = vrot.lane.b32.xlu1 %v878_v5, %s1037_s28 }
  0x25   : > { %639 = vrot.lane.b32.xlu1 %v877_v4, %s1037_s28 }
  0x87   : > { %v396_v20 = vpop.permute.xlu1 %395 }
  0x8b   : > { %v523_v23 = vpop.permute.xlu1 %522 }
  0x8c   : > { %v528_v24 = vsel %vm283_vm1, %v523_v23, 0 }
  0x8f   : > { %v521_v25 = vpop.permute.xlu1 %520 }
  0x93   : > { %v642_v26 = vpop.permute.xlu1 %641 }
  0x94   : > { %v647_v27 = vsel %vm283_vm1, %v642_v26, 0 }
  0x97   : > { %v640_v28 = vpop.permute.xlu1 %639 }
  0xed   : > { %v324_v7 = vpop.f32.mrb[0].mxu0 }
  0xee   : > { %v325_v8 = vadd.f32 %v1113_v6, %v324_v7  ;;  %v914_v9 = vpop.f32.mrb[1].mxu0 }
  0xef   : > { %v327_v10 = vpop.f32.mrb[2].mxu0 }
  0xf0   : > { %v915_v11 = vpop.f32.mrb[3].mxu0  ;;  %v330_v12 = vsel %vm283_vm1, %v325_v8, -inf }
  0xf1   : > { %331 = vmax.xlane.f32.xlu0 %v330_v12 }
 0x107   : > { %400 = vrot.lane.b32.xlu0 %v878_v5, %s1035_s26 }
 0x17e   : > { %v332_v15 = vpop.xlane.xlu0 %331 }
 0x17f   : > { %v333_v16 = vsub.f32 %v325_v8, %v332_v15 }
 0x181   : > { %v334_v17 = vmul.f32 1.442695, %v333_v16 }
 0x182   : > { %v401_v18 = vpop.permute.xlu0 %400 }
 0x183   : > { %993 = vpow2.f32 %v334_v17  ;;  %v406_v21 = vsel %vm283_vm1, %v401_v18, 0 }
 0x18d   : > { %v1124_v19 = vpop.eup %993 }
 0x18e   : > { %v339_v22 = vpack.c.bf16 %v1124_v19, %v1124_v19  ;;  %v336_v13 = vsel %vm283_vm1, %v1124_v19, 0.0 }
 0x190   : > { %919 = vmatmul.mubr.msk.bf16.vlgmr.msra.gmra.mrb[0].mxu1 %vm283_vm1, %v339_v22 }
 0x191   : > { %923 = vmatpush3.bf16.xpose.msra.mxu1 %v406_v21  ;;  %924 = vmatprep.mubr.msk.bf16.mxu1 %vm1034_vm0, %v1033_v0 }
 0x192   : > { %934 = vmatprep.subr.bf16.mxu1 %v1033_v0 }
 0x198   : > { %925 = vmatmul.mubr.msk.bf16.vlgmr.msra.gmra.mrb[4].mxu1 %vm283_vm1, %v396_v20 }
 0x199   : > { %935 = vmatpush3.bf16.xpose.msra.mxu1 %v528_v24  ;;  %936 = vmatprep.mubr.msk.bf16.mxu1 %vm1034_vm0, %v1033_v0 }
 0x19a   : > { %946 = vmatprep.subr.bf16.mxu1 %v1033_v0 }
 0x1a0   : > { %937 = vmatmul.mubr.msk.bf16.vlgmr.msra.gmra.mrb[8].mxu1 %vm283_vm1, %v521_v25 }
 0x1a1   : > { %947 = vmatpush3.bf16.xpose.msra.mxu1 %v647_v27  ;;  %948 = vmatprep.mubr.msk.bf16.mxu1 %vm1034_vm0, %v1033_v0 }
 0x1a8   : > { %949 = vmatmul.mubr.msk.bf16.vlgmr.msra.gmra.mrb[12].mxu1 %vm283_vm1, %v640_v28 }
 0x263   : > { %v1143_v29 = vpop.f32.mrb[0].mxu1 }
 0x264   : > { %v920_v30 = vpop.f32.mrb[1].mxu1 }
 0x265   : > { %v384_v31 = vpop.f32.mrb[2].mxu1 }
 0x266   : > { %v921_v32 = vpop.f32.mrb[3].mxu1 }
 0x26b   : > { %v442_v33 = vpop.f32.mrb[4].mxu1 }
 0x26c   : > { %v443_v34 = vadd.f32 %v1113_v6, %v442_v33  ;;  %v926_v35 = vpop.f32.mrb[5].mxu1 }
 0x26d   : > { %v445_v36 = vpop.f32.mrb[6].mxu1 }
 0x26e   : > { %v927_v37 = vpop.f32.mrb[7].mxu1  ;;  %v448_v38 = vsel %vm283_vm1, %v443_v34, -inf }
 0x26f   : > { %449 = vmax.xlane.f32.xlu1 %v448_v38 }
 0x273   : > { %v564_v39 = vpop.f32.mrb[8].mxu1 }
 0x274   : > { %v565_v40 = vadd.f32 %v1113_v6, %v564_v39  ;;  %v938_v41 = vpop.f32.mrb[9].mxu1 }
 0x275   : > { %v567_v42 = vpop.f32.mrb[10].mxu1 }
 0x276   : > { %v570_v43 = vsel %vm283_vm1, %v565_v40, -inf  ;;  %v939_v44 = vpop.f32.mrb[11].mxu1 }
 0x277   : > { %571 = vmax.xlane.f32.xlu0 %v570_v43 }
 0x27b   : > { %v683_v45 = vpop.f32.mrb[12].mxu1 }
 0x27c   : > { %v950_v47 = vpop.f32.mrb[13].mxu1  ;;  %v684_v50 = vadd.f32 %v1113_v6, %v683_v45 }
 0x27d   : > { %v686_v48 = vpop.f32.mrb[14].mxu1 }
 0x27e   : > { %v951_v49 = vpop.f32.mrb[15].mxu1  ;;  %v689_v51 = vsel %vm283_vm1, %v684_v50, -inf }
 0x280   : > { %580 = vrot.lane.b32.xlu1 %v880_v46, %s1036_s27 }
 0x28d   : > { %461 = vrot.lane.b32.xlu0 %v880_v46, %s1035_s26 }
 0x2a4   : > { %690 = vmax.xlane.f32.xlu1 %v689_v51 }
 0x2b5   : > { %699 = vrot.lane.b32.xlu1 %v880_v46, %s1037_s28 }
 0x2fc   : > { %v450_v52 = vpop.xlane.xlu1 %449 }
 0x2fd   : > { %v451_v53 = vsub.f32 %v443_v34, %v450_v52 }
 0x2ff   : > { %v452_v54 = vmul.f32 1.442695, %v451_v53 }
 0x300   : > { %v581_v61 = vpop.permute.xlu1 %580 }
 0x301   : > { %995 = vpow2.f32 %v452_v54  ;;  %v586_v1 = vsel %vm343_vm2, %v581_v61, 0 }
 0x304   : > { %v572_v55 = vpop.xlane.xlu0 %571 }
 0x305   : > { %v573_v56 = vsub.f32 %v565_v40, %v572_v55 }
 0x307   : > { %v574_v57 = vmul.f32 1.442695, %v573_v56 }
 0x308   : > { %v462_v58 = vpop.permute.xlu0 %461 }
 0x309   : > { %997 = vpow2.f32 %v574_v57  ;;  %v467_v59 = vsel %vm343_vm2, %v462_v58, 0 }
 0x30a   : > { %929 = vmatpush3.bf16.msra.mxu0 %v467_v59 }
 0x30b   : > { %v996_v60 = vpop.eup %995  ;;  %940 = vmatprep.subr.bf16.mxu0 %v1033_v0 }
 0x30c   : > { %v454_v62 = vsel %vm283_vm1, %v996_v60, 0.0  ;;  %v457_v63 = vpack.c.bf16 %v996_v60, %v996_v60 }
 0x30d   : > { %455 = vadd.xlane.f32.xlu0 %v454_v62 }
 0x30e   : > { %931 = vmatmul.mubr.msk.bf16.vlgmr.msra.gmra.mrb[4].mxu0 %vm283_vm1, %v457_v63 }
 0x30f   : > { %941 = vmatpush3.bf16.msra.mxu0 %v586_v1  ;;  %942 = vmatprep.mubr.msk.bf16.mxu0 %vm1034_vm0, %v1033_v0 }
 0x310   : > { %952 = vmatprep.subr.bf16.mxu0 %v1033_v0 }
 0x313   : > { %v998_v2 = vpop.eup %997 }
 0x314   : > { %v576_v3 = vsel %vm283_vm1, %v998_v2, 0.0  ;;  %v579_v4 = vpack.c.bf16 %v998_v2, %v998_v2 }
 0x315   : > { %577 = vadd.xlane.f32.xlu1 %v576_v3 }
 0x316   : > { %943 = vmatmul.mubr.msk.bf16.vlgmr.msra.gmra.mrb[8].mxu0 %vm283_vm1, %v579_v4 }
 0x317   : > { %954 = vmatprep.mubr.msk.bf16.mxu0 %vm1034_vm0, %v1033_v0 }
 0x331   : > { %v691_v5 = vpop.xlane.xlu1 %690 }
 0x332   : > { %v692_v6 = vsub.f32 %v684_v50, %v691_v5 }
 0x334   : > { %v693_v7 = vmul.f32 1.442695, %v692_v6 }
 0x335   : > { %v700_v8 = vpop.permute.xlu1 %699 }
 0x336   : > { %999 = vpow2.f32 %v693_v7  ;;  %v705_v9 = vsel %vm343_vm2, %v700_v8, 0 }
 0x337   : > { %953 = vmatpush3.bf16.msra.mxu0 %v705_v9 }
 0x340   : > { %v1000_v10 = vpop.eup %999 }
 0x341   : > { %v695_v11 = vsel %vm283_vm1, %v1000_v10, 0.0  ;;  %v698_v12 = vpack.c.bf16 %v1000_v10, %v1000_v10 }
 0x342   : > { %696 = vadd.xlane.f32.xlu0 %v695_v11 }
 0x343   : > { %955 = vmatmul.mubr.msk.bf16.vlgmr.msra.gmra.mrb[12].mxu0 %vm283_vm1, %v698_v12 }
 0x346   : > { %337 = vadd.xlane.f32.xlu0 %v336_v13 }
 0x39a   : > { %v456_v0 = vpop.xlane.xlu0 %455 }
 0x3a2   : > { %v578_v16 = vpop.xlane.xlu1 %577 }
 0x3cf   : > { %v697_v14 = vpop.xlane.xlu0 %696 }
 0x3d3   : > { %v338_v15 = vpop.xlane.xlu0 %337 }
 0x3d4   : > { %1001 = vrcp.f32 %v338_v15 }
 0x3d5   : > { %1003 = vrcp.f32 %v456_v0 }
 0x3d6   : > { %1005 = vrcp.f32 %v578_v16 }
 0x3d7   : > { %1007 = vrcp.f32 %v697_v14 }
 0x3de   : > { %v1002_v17 = vpop.eup %1001 }
 0x3df   : > { %v388_v18 = vmul.f32 %v1002_v17, %v1143_v29  ;;  %v1004_v20 = vpop.eup %1003 }
 0x3e0   : > { %v1006_v27 = vpop.eup %1005 }
 0x3e1   : > { %v503_v19 = vpop.f32.mrb[4].mxu0  ;;  %v389_v21 = vpack.c.bf16 %v388_v18, %v388_v18  ;;  %v1008_v34 = vpop.eup %1007 }
 0x3e2   : > { %v510_v22 = vmul.f32 %v1004_v20, %v503_v19  ;;  %v932_v23 = vpop.f32.mrb[5].mxu0 }
 0x3e3   : > { %v506_v24 = vpop.f32.mrb[6].mxu0  ;;  %391 = vst.msk [vmem:[%s1176_s11] sm:$0xf] %vm390_vm3, %v389_v21 }
 0x3e4   : > { %v891_v25 = vpack.c.bf16 %v510_v22, %v510_v22  ;;  %v933_v26 = vpop.f32.mrb[7].mxu0 }
 0x3e6   : > { %515 = vrot.lane.b32.xlu1 %v891_v25, %s1038_s12 }
 0x3e9   : > { %v622_v28 = vpop.f32.mrb[8].mxu0 }
 0x3ea   : > { %v629_v29 = vmul.f32 %v1006_v27, %v622_v28  ;;  %v944_v30 = vpop.f32.mrb[9].mxu0 }
 0x3eb   : > { %v625_v31 = vpop.f32.mrb[10].mxu0 }
 0x3ec   : > { %v892_v32 = vpack.c.bf16 %v629_v29, %v629_v29  ;;  %v945_v33 = vpop.f32.mrb[11].mxu0 }
 0x3ee   : > { %634 = vrot.lane.b32.xlu0 %v892_v32, %s1039_s13 }
 0x416   : > { %v741_v35 = vpop.f32.mrb[12].mxu0 }
 0x417   : > { %v748_v36 = vmul.f32 %v1008_v34, %v741_v35  ;;  %v956_v37 = vpop.f32.mrb[13].mxu0 }
 0x418   : > { %v744_v38 = vpop.f32.mrb[14].mxu0 }
 0x419   : > { %v893_v39 = vpack.c.bf16 %v748_v36, %v748_v36  ;;  %v957_v40 = vpop.f32.mrb[15].mxu0 }
 0x41b   : > { %753 = vrot.lane.b32.xlu1 %v893_v39, %s1040_s14 }
 0x458   : > { %v516_v41 = vpop.permute.xlu1 %515 }
 0x459   : > { %519 = vst.msk [vmem:[%s1176_s11] sm:$0xf] %vm518_vm4, %v516_v41 }
 0x460   : > { %v635_v42 = vpop.permute.xlu0 %634 }
 0x461   : > { %638 = vst.msk [vmem:[%s1176_s11] sm:$0xf] %vm637_vm5, %v635_v42 }
 0x48d   : > { %v754_v43 = vpop.permute.xlu1 %753 }
 0x48e   : > { %757 = vst.msk [vmem:[%s1176_s11] sm:$0xf] %vm756_vm6, %v754_v43 }
 0x48f PF: > { %s14_s17 = sadd.s32 1, %s1031_s17   ;;  %s1196_s15 = smov %s1027_s16 }
 0x490   : > { %p11_p5 = scmp.ge.s32.totalorder %s14_s17, 4   ;;  %s1197_s16 = smov %s1199_s18 }
 0x492   :  { %13 = sbr.rel (!%p11_p5) target bundleno = 2 (0x2), region = 75 }

</bundles_post_ra>
